<compile_context>
chip_gen: v5e
topology: v5e:2x2
jax: 0.10.0
libtpu: 0.0.40
codegen_flags: <defaults>
</compile_context>

<pallas_src>
import functools

import jax
import jax.numpy as jnp
from jax import lax
from jax.experimental import pallas as pl
from jax.experimental.pallas import tpu as pltpu


def _feature_loss_kernel(other_ref, text_ref, out_ref,
                         text_n_ref, other_n_ref, acc_ref, *, temp, tm):
    i = pl.program_id(0)
    n = pl.num_programs(0)
    B = text_ref.shape[0]

    # ---- one-time setup (grid step 0): L2-normalize rows into VMEM scratch.
    @pl.when(i == 0)
    def _():
        eps = 1e-12  # F.normalize default eps
        text = text_ref[...].astype(jnp.float32)
        other = other_ref[...].astype(jnp.float32)
        # x / max(||x||, eps) == x * min(rsqrt(sum x^2), 1/eps): one EUP rsqrt.
        inv_t = jnp.minimum(
            lax.rsqrt(jnp.sum(text * text, axis=1, keepdims=True)),
            jnp.float32(1.0 / eps))
        inv_o = jnp.minimum(
            lax.rsqrt(jnp.sum(other * other, axis=1, keepdims=True)),
            jnp.float32(1.0 / eps))
        text_n_ref[...] = text * inv_t
        other_n_ref[...] = other * inv_o
        acc_ref[0] = jnp.float32(0.0)

    # ---- per-tile work: rows [i*tm, (i+1)*tm) of the score matrices.
    row0 = pl.multiple_of(i * tm, tm)
    # Fold 1/temp into the LHS rows once (O(tm*D)) instead of two (tm, B) slabs.
    lhs = text_n_ref[pl.ds(row0, tm), :] * jnp.float32(1.0 / temp)   # (tm, D)

    # Contract dim 1 of both operands (== lhs @ rhs.T), no explicit transpose.
    dn = (((1,), (1,)), ((), ()))
    target = lax.dot_general(lhs, text_n_ref[...], dimension_numbers=dn,
                             preferred_element_type=jnp.float32)     # (tm, B)
    x = lax.dot_general(lhs, other_n_ref[...], dimension_numbers=dn,
                        preferred_element_type=jnp.float32)          # (tm, B)

    # Row-wise (dim=1) softmax / log-softmax statistics (rows are complete).
    t_max = jnp.max(target, axis=1, keepdims=True)
    x_max = jnp.max(x, axis=1, keepdims=True)
    t_exp = jnp.exp(target - t_max)
    t_sum = jnp.sum(t_exp, axis=1, keepdims=True)
    x_sum = jnp.sum(jnp.exp(x - x_max), axis=1, keepdims=True)

    p = t_exp * pl.reciprocal(t_sum, approx=False)          # softmax(target/t)

    # log_p - log_q without materializing log_p / log_q.
    log_ratio = (target - x) + (x_max - t_max) + (jnp.log(x_sum) - jnp.log(t_sum))

    acc_ref[0] += jnp.sum(p * log_ratio)

    # ---- finalize: KL(p || q) with reduction='batchmean'.
    @pl.when(i == n - 1)
    def _():
        out_ref[0, 0] = acc_ref[0] / jnp.float32(B)


def _pick_row_tile(B):
    """Largest divisor of B whose ~8 live (tm, B) f32 slabs fit ~24 MiB."""
    bp_lane = -(-B // 128) * 128
    cap = max(8, (24 << 20) // (8 * 4 * bp_lane))
    divs = [d for d in range(1, B + 1) if B % d == 0 and d <= cap]
    if not divs:
        return B
    mult8 = [d for d in divs if d % 8 == 0]
    return mult8[-1] if mult8 else divs[-1]


def feature_loss(other_embd, text_embd, temp=1.0):
    """Pallas implementation of Feature_Loss.forward. Returns a scalar f32."""
    assert other_embd.shape == text_embd.shape and other_embd.ndim == 2
    B, D = text_embd.shape
    tm = _pick_row_tile(B)
    grid = (B // tm,)

    # VMEM budget: inputs + normalized scratches + per-tile score temporaries.
    dp = -(-D // 128) * 128
    bp_lane = -(-B // 128) * 128
    bs = -(-B // 8) * 8
    est = 4 * (4 * bs * dp + tm * dp + 8 * tm * bp_lane)
    est = 2 * est + (2 << 20)
    vmem_limit = min(max(est, 16 << 20), 64 << 20)

    # TODO(synk): for B large enough that the (B, D) normalized operands no
    # longer fit VMEM, add a second (column/K) tiling level with an online
    # softmax-style rescale; not needed at embedding-batch sizes.
    kernel = functools.partial(_feature_loss_kernel, temp=float(temp), tm=tm)
    out = pl.pallas_call(
        kernel,
        out_shape=jax.ShapeDtypeStruct((1, 1), jnp.float32),
        grid=grid,
        in_specs=[
            pl.BlockSpec((B, D), lambda i: (0, 0)),   # other: fetched once
            pl.BlockSpec((B, D), lambda i: (0, 0)),   # text:  fetched once
        ],
        out_specs=pl.BlockSpec((1, 1), lambda i: (0, 0),
                               memory_space=pltpu.SMEM),
        scratch_shapes=[
            pltpu.VMEM((B, D), jnp.float32),   # normalized text
            pltpu.VMEM((B, D), jnp.float32),   # normalized other
            pltpu.SMEM((1,), jnp.float32),     # KL partial-sum accumulator
        ],
        compiler_params=pltpu.CompilerParams(
            dimension_semantics=("arbitrary",),
            vmem_limit_bytes=vmem_limit),
    )(other_embd, text_embd)
    return out[0, 0]


def _reference(other_embd, text_embd, temp=1.0):
    """Pure-JAX reference for a sanity check."""
    eps = 1e-12
    t = text_embd / jnp.maximum(
        jnp.linalg.norm(text_embd, axis=1, keepdims=True), eps)
    o = other_embd / jnp.maximum(
        jnp.linalg.norm(other_embd, axis=1, keepdims=True), eps)
    target = (t @ t.T) / temp
    x = (t @ o.T) / temp
    log_q = jax.nn.log_softmax(x, axis=1)
    p = jax.nn.softmax(target, axis=1)
    log_p = jax.nn.log_softmax(target, axis=1)
    return jnp.sum(p * (log_p - log_q)) / text_embd.shape[0]


if __name__ == "__main__":
    B, D = 8, 32  # small embedding batch / hidden size
    key = jax.random.PRNGKey(0)
    k1, k2 = jax.random.split(key)
    other_embd = jax.random.normal(k1, (B, D), dtype=jnp.float32)
    text_embd = jax.random.normal(k2, (B, D), dtype=jnp.float32)

    loss = feature_loss(other_embd, text_embd, temp=1.0)
    jax.block_until_ready(loss)

    ref = _reference(other_embd, text_embd, temp=1.0)
    assert jnp.allclose(loss, ref, atol=1e-5, rtol=1e-4), (loss, ref)

    print("KERNEL_OK")
</pallas_src>

<mosaic_0001>
module attributes {stable_mosaic.version = 11 : i64} {
  func.func @_feature_loss_kernel(%arg0: i32, %arg1: memref<8x32xf32, #tpu.memory_space<vmem>>, %arg2: memref<8x32xf32, #tpu.memory_space<vmem>>, %arg3: memref<1x1xf32, #tpu.memory_space<smem>>, %arg4: memref<8x32xf32, #tpu.memory_space<vmem>>, %arg5: memref<8x32xf32, #tpu.memory_space<vmem>>, %arg6: memref<1xf32, #tpu.memory_space<smem>>) attributes {dimension_semantics = [#tpu.dimension_semantics<arbitrary>], iteration_bounds = array<i64: 1>, scalar_prefetch = 0 : i64, scratch_operands = 3 : i64, tpu.core_type = #tpu.core_type<tc>, window_params = [{pipeline_mode = #tpu.pipeline_mode<synchronous>, transform_indices = @transform_0, window_bounds = array<i64: 8, 32>}, {pipeline_mode = #tpu.pipeline_mode<synchronous>, transform_indices = @transform_1, window_bounds = array<i64: 8, 32>}, {transform_indices = @transform_2, window_bounds = array<i64: 1, 1>}]} {
    %c0_i32 = arith.constant 0 : i32
    %0 = arith.cmpi eq, %arg0, %c0_i32 : i32
    %1 = arith.extui %0 : i1 to i32
    %c0_i32_0 = arith.constant 0 : i32
    %2 = arith.cmpi ne, %1, %c0_i32_0 : i32
    scf.if %2 {
      %c0_16 = arith.constant 0 : index
      %c0_17 = arith.constant 0 : index
      %50 = vector.load %arg2[%c0_16, %c0_17] : memref<8x32xf32, #tpu.memory_space<vmem>>, vector<8x32xf32>
      %c0_18 = arith.constant 0 : index
      %c0_19 = arith.constant 0 : index
      %51 = vector.load %arg1[%c0_18, %c0_19] : memref<8x32xf32, #tpu.memory_space<vmem>>, vector<8x32xf32>
      %52 = arith.mulf %50, %50 : vector<8x32xf32>
      %cst_20 = arith.constant dense<0.000000e+00> : vector<8xf32>
      %53 = vector.multi_reduction <add>, %52, %cst_20 [1] : vector<8x32xf32> to vector<8xf32>
      %54 = vector.shape_cast %53 : vector<8xf32> to vector<8x1xf32>
      %55 = math.rsqrt %54 : vector<8x1xf32>
      %cst_21 = arith.constant 9.99999995E+11 : f32
      %56 = vector.broadcast %cst_21 : f32 to vector<8x1xf32>
      %57 = arith.minimumf %55, %56 : vector<8x1xf32>
      %58 = arith.mulf %51, %51 : vector<8x32xf32>
      %cst_22 = arith.constant dense<0.000000e+00> : vector<8xf32>
      %59 = vector.multi_reduction <add>, %58, %cst_22 [1] : vector<8x32xf32> to vector<8xf32>
      %60 = vector.shape_cast %59 : vector<8xf32> to vector<8x1xf32>
      %61 = math.rsqrt %60 : vector<8x1xf32>
      %cst_23 = arith.constant 9.99999995E+11 : f32
      %62 = vector.broadcast %cst_23 : f32 to vector<8x1xf32>
      %63 = arith.minimumf %61, %62 : vector<8x1xf32>
      %64 = vector.broadcast %57 : vector<8x1xf32> to vector<8x32xf32>
      %65 = arith.mulf %50, %64 : vector<8x32xf32>
      %c0_24 = arith.constant 0 : index
      %c0_25 = arith.constant 0 : index
      %66 = vector.load %arg4[%c0_24, %c0_25] : memref<8x32xf32, #tpu.memory_space<vmem>>, vector<8x32xf32>
      tpu.vector_store %arg4[%c0_24, %c0_25], %65 {strides = array<i32>} : memref<8x32xf32, #tpu.memory_space<vmem>>, vector<8x32xf32>,
      %67 = vector.broadcast %63 : vector<8x1xf32> to vector<8x32xf32>
      %68 = arith.mulf %51, %67 : vector<8x32xf32>
      %c0_26 = arith.constant 0 : index
      %c0_27 = arith.constant 0 : index
      %69 = vector.load %arg5[%c0_26, %c0_27] : memref<8x32xf32, #tpu.memory_space<vmem>>, vector<8x32xf32>
      tpu.vector_store %arg5[%c0_26, %c0_27], %68 {strides = array<i32>} : memref<8x32xf32, #tpu.memory_space<vmem>>, vector<8x32xf32>,
      %cst_28 = arith.constant 0.000000e+00 : f32
      %c0_29 = arith.constant 0 : index
      %70 = memref.load %arg6[%c0_29] : memref<1xf32, #tpu.memory_space<smem>>
      memref.store %cst_28, %arg6[%c0_29] : memref<1xf32, #tpu.memory_space<smem>>
    } else {
    }
    %c8_i32 = arith.constant 8 : i32
    %3 = arith.muli %arg0, %c8_i32 : i32
    %4 = tpu.assume_multiple %3, 8 : i32
    %5 = arith.index_cast %4 : i32 to index
    %c0 = arith.constant 0 : index
    %6 = vector.load %arg4[%5, %c0] : memref<8x32xf32, #tpu.memory_space<vmem>>, vector<8x32xf32>
    %cst = arith.constant 1.000000e+00 : f32
    %7 = vector.broadcast %cst : f32 to vector<8x32xf32>
    %8 = arith.mulf %6, %7 : vector<8x32xf32>
    %c0_1 = arith.constant 0 : index
    %c0_2 = arith.constant 0 : index
    %9 = vector.load %arg4[%c0_1, %c0_2] : memref<8x32xf32, #tpu.memory_space<vmem>>, vector<8x32xf32>
    %cst_3 = arith.constant dense<0.000000e+00> : vector<8x8xf32>
    %10 = tpu.matmul %8, %9, %cst_3 {dimension_numbers = #tpu.dot_dimension_numbers<[1], [1], [0], [0], [0, 0, 1, 0], [], []>} : vector<8x32xf32>, vector<8x32xf32>, vector<8x8xf32> -> vector<8x8xf32>
    %c0_4 = arith.constant 0 : index
    %c0_5 = arith.constant 0 : index
    %11 = vector.load %arg5[%c0_4, %c0_5] : memref<8x32xf32, #tpu.memory_space<vmem>>, vector<8x32xf32>
    %cst_6 = arith.constant dense<0.000000e+00> : vector<8x8xf32>
    %12 = tpu.matmul %8, %11, %cst_6 {dimension_numbers = #tpu.dot_dimension_numbers<[1], [1], [0], [0], [0, 0, 1, 0], [], []>} : vector<8x32xf32>, vector<8x32xf32>, vector<8x8xf32> -> vector<8x8xf32>
    %cst_7 = arith.constant dense<0xFF800000> : vector<8xf32>
    %13 = vector.multi_reduction <maximumf>, %10, %cst_7 [1] : vector<8x8xf32> to vector<8xf32>
    %14 = vector.shape_cast %13 : vector<8xf32> to vector<8x1xf32>
    %cst_8 = arith.constant dense<0xFF800000> : vector<8xf32>
    %15 = vector.multi_reduction <maximumf>, %12, %cst_8 [1] : vector<8x8xf32> to vector<8xf32>
    %16 = vector.shape_cast %15 : vector<8xf32> to vector<8x1xf32>
    %17 = vector.broadcast %14 : vector<8x1xf32> to vector<8x8xf32>
    %18 = arith.subf %10, %17 : vector<8x8xf32>
    %19 = math.exp %18 : vector<8x8xf32>
    %cst_9 = arith.constant dense<0.000000e+00> : vector<8xf32>
    %20 = vector.multi_reduction <add>, %19, %cst_9 [1] : vector<8x8xf32> to vector<8xf32>
    %21 = vector.shape_cast %20 : vector<8xf32> to vector<8x1xf32>
    %22 = vector.broadcast %16 : vector<8x1xf32> to vector<8x8xf32>
    %23 = arith.subf %12, %22 : vector<8x8xf32>
    %24 = math.exp %23 : vector<8x8xf32>
    %cst_10 = arith.constant dense<0.000000e+00> : vector<8xf32>
    %25 = vector.multi_reduction <add>, %24, %cst_10 [1] : vector<8x8xf32> to vector<8xf32>
    %26 = vector.shape_cast %25 : vector<8xf32> to vector<8x1xf32>
    %27 = tpu.reciprocal %21 : vector<8x1xf32> -> vector<8x1xf32>
    %28 = vector.broadcast %27 : vector<8x1xf32> to vector<8x8xf32>
    %29 = arith.mulf %19, %28 : vector<8x8xf32>
    %30 = arith.subf %10, %12 : vector<8x8xf32>
    %31 = arith.subf %16, %14 : vector<8x1xf32>
    %32 = vector.broadcast %31 : vector<8x1xf32> to vector<8x8xf32>
    %33 = arith.addf %30, %32 : vector<8x8xf32>
    %34 = math.log %26 : vector<8x1xf32>
    %35 = math.log %21 : vector<8x1xf32>
    %36 = arith.subf %34, %35 : vector<8x1xf32>
    %37 = vector.broadcast %36 : vector<8x1xf32> to vector<8x8xf32>
    %38 = arith.addf %33, %37 : vector<8x8xf32>
    %c0_11 = arith.constant 0 : index
    %39 = memref.load %arg6[%c0_11] : memref<1xf32, #tpu.memory_space<smem>>
    %40 = arith.mulf %29, %38 : vector<8x8xf32>
    %41 = vector.shape_cast %40 : vector<8x8xf32> to vector<1x8x8xf32>
    %cst_12 = arith.constant dense<0.000000e+00> : vector<1xf32>
    %42 = vector.multi_reduction <add>, %41, %cst_12 [1, 2] : vector<1x8x8xf32> to vector<1xf32>
    %43 = vector.shape_cast %42 : vector<1xf32> to vector<1x1x1xf32>
    %44 = vector.extract %43[0, 0, 0] : f32 from vector<1x1x1xf32>
    %45 = arith.addf %39, %44 : f32
    %c0_13 = arith.constant 0 : index
    %46 = memref.load %arg6[%c0_13] : memref<1xf32, #tpu.memory_space<smem>>
    memref.store %45, %arg6[%c0_13] : memref<1xf32, #tpu.memory_space<smem>>
    %c0_i32_14 = arith.constant 0 : i32
    %47 = arith.cmpi eq, %arg0, %c0_i32_14 : i32
    %48 = arith.extui %47 : i1 to i32
    %c0_i32_15 = arith.constant 0 : i32
    %49 = arith.cmpi ne, %48, %c0_i32_15 : i32
    scf.if %49 {
      %c0_16 = arith.constant 0 : index
      %50 = memref.load %arg6[%c0_16] : memref<1xf32, #tpu.memory_space<smem>>
      %cst_17 = arith.constant 8.000000e+00 : f32
      %51 = arith.divf %50, %cst_17 : f32
      %c0_18 = arith.constant 0 : index
      %c0_19 = arith.constant 0 : index
      %52 = memref.load %arg3[%c0_18, %c0_19] : memref<1x1xf32, #tpu.memory_space<smem>>
      memref.store %51, %arg3[%c0_18, %c0_19] : memref<1x1xf32, #tpu.memory_space<smem>>
    } else {
    }
    return
  }
  func.func @transform_0(%arg0: i32) -> (i32, i32) {
    %c0_i32 = arith.constant 0 : i32
    %c0_i32_0 = arith.constant 0 : i32
    %c0_i32_1 = arith.constant 0 : i32
    return %c0_i32, %c0_i32_0 : i32, i32
  }
  func.func @transform_1(%arg0: i32) -> (i32, i32) {
    %c0_i32 = arith.constant 0 : i32
    %c0_i32_0 = arith.constant 0 : i32
    %c0_i32_1 = arith.constant 0 : i32
    return %c0_i32, %c0_i32_0 : i32, i32
  }
  func.func @transform_2(%arg0: i32) -> (i32, i32) {
    %c0_i32 = arith.constant 0 : i32
    %c0_i32_0 = arith.constant 0 : i32
    %c0_i32_1 = arith.constant 0 : i32
    return %c0_i32, %c0_i32_0 : i32, i32
  }
}

</mosaic_0001>

<bundles_post_ra>
// kernel: tpu_custom_call.1
= control target key start
LH: loop header
LB: loop body
LE: loop exit
PB: predicated region body
PF: predicated region fallthrough
CT: control target
= control target key end

     0   :  { %7 = vsyncpa [#allocation6], 0  ;;  %s363_s0 = inlined_call_operand.hbm [shape: f32[8,32], index: 0, kind: input, shape index: {}]   ;;  %s364_s1 = inlined_call_operand.hbm [shape: f32[8,32], index: 1, kind: input, shape index: {}]   ;;  %s365_s2 = inlined_call_operand.hbm [shape: f32[1,1], index: 2, kind: output, shape index: {}]  }
   0x1   :  { %8 = vsyncpa [#allocation9], 0 }
   0x2   :  { %9 = vsyncpa [#allocation7], 0  ;;  %s15_s11 = sshll.u32 %s363_s0, 4  ;;  %s322_s12 = smov [#allocation5]   ;;  %s16_s11 = int_to_ptr.hbm [resolvable:$true] %s15_s11 }
   0x3   :  { %s17_s13 = sshll.u32 %s322_s12, 4  ;;  %s26_s16 = sshll.u32 %s364_s1, 4  ;;  %s18_s13 = int_to_ptr.vmem [resolvable:$true] %s17_s13  ;;  %s27_s16 = int_to_ptr.hbm [resolvable:$true] %s26_s16 }
   0x4   :  { %20 = dma.hbm_to_vmem [thread:$0]  %s16_s11, 128, %s18_s13, [#allocation6]  }
   0x5   :  { %s323_s17 = smov [#allocation8]  }
   0x6   :  { %s28_s18 = sshll.u32 %s323_s17, 4  ;;  %s29_s18 = int_to_ptr.vmem [resolvable:$true] %s28_s18 }
   0x7   :  { %31 = dma.hbm_to_vmem [thread:$0]  %s27_s16, 128, %s29_s18, [#allocation9]  }
   0x8   :  { %316 = dma.done.wait [#allocation6], 128  }
   0x9   :  { %317 = vsyncadd [#allocation6], 4294967168 }
   0xa   :  { %318 = dma.done.wait [#allocation9], 128  }
   0xb   :  { %319 = vsyncadd [#allocation9], 4294967168  ;;  %v44_v0 = vld [vmem:[#allocation8] sm:$0xff]  ;;  %vm47_vm0 = vcmask 261120   ;;  %v45_v2 = vld [vmem:[#allocation5] sm:$0xff]  ;;  %vm138_vm7 = vcmask 64512  }
   0xc   :  { %v46_v1 = vmul.f32 %v44_v0, %v44_v0  ;;  %v62_v4 = vmul.f32 %v45_v2, %v45_v2  ;;  %s216_s19 = sshll.u32 %s365_s2, 4  ;;  %s325_s23 = smov [#allocation10]   ;;  %s217_s19 = int_to_ptr.hbm [resolvable:$true] %s216_s19 }
   0xe   :  { %v48_v3 = vsel %vm47_vm0, %v46_v1, 0.0  ;;  %v63_v5 = vsel %vm47_vm0, %v62_v4, 0.0 }
   0xf   :  { %49 = vadd.xlane.f32.xlu0 %v48_v3 }
  0x17   :  { %64 = vadd.xlane.f32.xlu0 %v63_v5 }
  0x82   :  { %v50_v6 = vpop.xlane.xlu0 %49 }
  0x83   :  { %240 = vrsqrt.f32 %v50_v6  ;;  %vm57_vm2 = vweird.f32 %v50_v6 }
  0x89   :  { %v241_v7 = vpop.eup %240 }
  0x8a   :  { %v52_v8 = vmul.f32 %v241_v7, %v50_v6  ;;  %v65_v9 = vpop.xlane.xlu0 %64  ;;  %vm58_vm1 = vweird.f32 %v241_v7 }
  0x8b   :  { %242 = vrsqrt.f32 %v65_v9  ;;  %vm59_vm3 = vmor %vm57_vm2, %vm58_vm1  ;;  %vm72_vm5 = vweird.f32 %v65_v9 }
  0x8c   :  { %v53_v10 = vmul.f32 %v241_v7, %v52_v8 }
  0x8e   :  { %v54_v11 = vmul.f32 0.5, %v53_v10 }
  0x90   :  { %v55_v12 = vsub.f32 1.5, %v54_v11 }
  0x91   :  { %v243_v13 = vpop.eup %242 }
  0x92   :  { %v56_v14 = vmul.f32 %v241_v7, %v55_v12  ;;  %v67_v15 = vmul.f32 %v243_v13, %v65_v9  ;;  %vm73_vm4 = vweird.f32 %v243_v13 }
  0x93   :  { %vm74_vm6 = vmor %vm72_vm5, %vm73_vm4 }
  0x94   :  { %v60_v16 = vsel %vm59_vm3, %v241_v7, %v56_v14  ;;  %v68_v17 = vmul.f32 %v243_v13, %v67_v15 }
  0x95   :  { %v61_v18 = vmin.f32 %v60_v16, 1e+12 }
  0x96   :  { %v69_v19 = vmul.f32 0.5, %v68_v17 }
  0x97   :  { %v77_v20 = vmul.f32 %v61_v18, %v44_v0 }
  0x98   :  { %v70_v21 = vsub.f32 1.5, %v69_v19 }
  0x99   :  { %78 = vst.msk [vmem:[#allocation2] sm:$0xff] %vm47_vm0, %v77_v20 }
  0x9a   :  { %v71_v22 = vmul.f32 %v243_v13, %v70_v21 }
  0x9c   :  { %v75_v23 = vsel %vm74_vm6, %v243_v13, %v71_v22 }
  0x9d   :  { %v76_v24 = vmin.f32 %v75_v23, 1e+12 }
  0x9f   :  { %v79_v25 = vmul.f32 %v76_v24, %v45_v2  ;;  %v324_v2 = vmov 8.0  }
  0xa0   :  { %v86_v26 = vld [vmem:[#allocation2] sm:$0xff] }
  0xa1   :  { %80 = vst.msk [vmem:[#allocation3] sm:$0xff] %vm47_vm0, %v79_v25  ;;  %228 = vmatpush.xpose.msk.msra.mxu0 %vm47_vm0, %v86_v26 }
  0xa4   :  { %229 = vmatmul.msk.f32.vlgmr.msra.gmra.mxu0 %vm47_vm0, %v86_v26 }
  0xa8   :  { %v114_v27 = vld [vmem:[#allocation3] sm:$0xff] }
  0xa9   :  { %230 = vmatpush.xpose.msk.msra.mxu1 %vm47_vm0, %v114_v27 }
  0xac   :  { %231 = vmatmul.msk.f32.vlgmr.msra.gmra.mxu1 %vm47_vm0, %v86_v26 }
 0x121   :  { %v111_v28 = vpop.f32.mrf.mxu0 }
 0x122   :  { %v139_v29 = vsel %vm138_vm7, %v111_v28, -inf }
 0x123   :  { %140 = vmax.xlane.f32.xlu1 %v139_v29 }
 0x129   :  { %v135_v30 = vpop.f32.mrf.mxu1 }
 0x12a   :  { %v142_v31 = vsel %vm138_vm7, %v135_v30, -inf  ;;  %v172_v54 = vsub.f32 %v111_v28, %v135_v30 }
 0x12b   :  { %143 = vmax.xlane.f32.xlu1 %v142_v31 }
 0x196   :  { %v141_v32 = vpop.xlane.xlu1 %140 }
 0x197   :  { %v145_v33 = vsub.f32 %v111_v28, %v141_v32 }
 0x199   :  { %v146_v34 = vmul.f32 1.442695, %v145_v33 }
 0x19b   :  { %244 = vpow2.f32 %v146_v34 }
 0x19e   :  { %v144_v35 = vpop.xlane.xlu1 %143 }
 0x19f   :  { %v151_v36 = vsub.f32 %v135_v30, %v144_v35  ;;  %v173_v37 = vsub.f32 %v144_v35, %v141_v32 }
 0x1a1   :  { %v245_v38 = vpop.eup %244  ;;  %v152_v39 = vmul.f32 1.442695, %v151_v36  ;;  %v174_v60 = vadd.f32 %v173_v37, %v172_v54 }
 0x1a2   :  { %v148_v40 = vsel %vm138_vm7, %v245_v38, 0.0 }
 0x1a3   :  { %246 = vpow2.f32 %v152_v39  ;;  %149 = vadd.xlane.f32.xlu2 %v148_v40 }
 0x1a9   :  { %v247_v41 = vpop.eup %246 }
 0x1aa   :  { %v154_v42 = vsel %vm138_vm7, %v247_v41, 0.0 }
 0x1ab   :  { %155 = vadd.xlane.f32.xlu2 %v154_v42 }
 0x216   :  { %v150_v43 = vpop.xlane.xlu2 %149 }
 0x217   :  { %248 = vrcp.f32 %v150_v43  ;;  %v168_v48 = vand.u32 2147483648, %v150_v43  ;;  %v166_v50 = vand.u32 2147483647, %v150_v43  ;;  %vm162_vm9 = vweird.f32 %v150_v43 }
 0x218   :  { %250 = vlog2.f32 %v150_v43 }
 0x219   :  { %v169_v55 = vor.u32 1.1754944e-38, %v168_v48  ;;  %vm167_vm11 = vcmp.eq.f32.partialorder %v166_v50, 8.507059e+37 }
 0x21d   :  { %v249_v44 = vpop.eup %248 }
 0x21e   :  { %v158_v45 = vmul.f32 %v249_v44, %v150_v43  ;;  %v156_v46 = vpop.xlane.xlu2 %155  ;;  %vm163_vm8 = vweird.f32 %v249_v44  ;;  %v251_v51 = vpop.eup %250 }
 0x21f   :  { %252 = vlog2.f32 %v156_v46  ;;  %vm164_vm10 = vmor %vm162_vm9, %vm163_vm8  ;;  %v178_v56 = vmul.f32 0.6931472, %v251_v51 }
 0x220   :  { %v159_v47 = vsub.f32 1.0, %v158_v45  ;;  %254 = vrcp.f32 %v324_v2 }
 0x222   :  { %v160_v49 = vmul.f32 %v249_v44, %v159_v47 }
 0x224   :  { %v161_v52 = vadd.f32 %v249_v44, %v160_v49 }
 0x225   :  { %v253_v53 = vpop.eup %252 }
 0x226   :  { %v176_v57 = vmul.f32 0.6931472, %v253_v53  ;;  %v165_v58 = vsel %vm164_vm10, %v249_v44, %v161_v52  ;;  %v255_v3 = vpop.eup %254 }
 0x227   :  { %v170_v59 = vsel %vm167_vm11, %v169_v55, %v165_v58  ;;  %v201_v4 = vmul.f32 8.0, %v255_v3  ;;  %vm205_vm12 = vweird.f32 %v255_v3 }
 0x228   :  { %v179_v61 = vsub.f32 %v176_v57, %v178_v56  ;;  %v171_v62 = vmul.f32 %v245_v38, %v170_v59 }
 0x229   :  { %v202_v5 = vsub.f32 1.0, %v201_v4 }
 0x22a   :  { %v180_v63 = vadd.f32 %v179_v61, %v174_v60 }
 0x22b   :  { %v203_v9 = vmul.f32 %v255_v3, %v202_v5 }
 0x22c   :  { %v182_v0 = vmul.f32 %v180_v63, %v171_v62 }
 0x22d   :  { %v204_v12 = vadd.f32 %v255_v3, %v203_v9 }
 0x22e   :  { %v183_v1 = vsel %vm138_vm7, %v182_v0, 0.0 }
 0x22f   :  { %184 = vadd.xlane.f32.xlu0 %v183_v1  ;;  %v206_v15 = vsel %vm205_vm12, %v255_v3, %v204_v12 }
 0x2a2   :  { %v185_v6 = vpop.xlane.xlu0 %184 }
 0x2a3   :  { %v186_v7 = vrot.slane %v185_v6, 4 }
 0x2a5   :  { %v187_v8 = vadd.f32 %v186_v7, %v185_v6 }
 0x2a7   :  { %v188_v10 = vrot.slane %v187_v8, 2 }
 0x2a9   :  { %v189_v11 = vadd.f32 %v188_v10, %v187_v8 }
 0x2ab   :  { %v190_v13 = vrot.slane %v189_v11, 1 }
 0x2ad   :  { %v191_v14 = vadd.f32 %v190_v13, %v189_v11 }
 0x2af   :  { %232 = vpush %v191_v14 }
 0x2b0   :  { %234 = vpush %v206_v15 }
 0x2e0   :  { %s233_s20 = spop %232 }
 0x2e1   :  { %s235_s21 = spop %234 }
 0x2e2   :  { %s208_s22 = smul.f32 %s235_s21, %s233_s20 }
 0x2e4   :  { %210 = sst [smem:[#allocation10]] %s208_s22 }
 0x2e5   :  { %219 = dma.smem_to_hbm %s325_s23, 16, %s217_s19, [#allocation7]  }
 0x2e6   :  { %320 = dma.done.wait [#allocation7], 16  }
 0x2e7   :  { %321 = vsyncadd [#allocation7], 4294967280 }
 0x2e8   :  { %224 = sfence }
 0x2e9   :  { %225 = vsyncpa [#allocation6], 1 }
 0x2ea   :  { %226 = vsyncpa [#allocation9], 1 }
 0x2eb   :  { %227 = vsyncpa [#allocation7], 1 }

</bundles_post_ra>
